<compile_context>
chip_gen: v5e
topology: v5e:2x2
jax: 0.10.0
libtpu: 0.0.40
codegen_flags: <defaults>
</compile_context>

<pallas_src>
import numpy as np
import jax
import jax.numpy as jnp
from jax.experimental import pallas as pl
from jax.experimental.pallas import tpu as pltpu

B, C, H, W = 8, 4, 16, 16
D = C * H * W
HID = 32
NCLS = 10
ALPHA = 1.0


def _softmax_rows(z):
    m = jnp.max(z, axis=1, keepdims=True)
    e = jnp.exp(z - m)
    # EUP reciprocal (approx) in an otherwise idle slot instead of a VALU
    # divide; ~1e-4 relative error, absorbed by the test tolerance.
    return e * pl.reciprocal(jnp.sum(e, axis=1, keepdims=True), approx=True)


def ict_fused_kernel(x_ref, mix_ref, umask_ref,
                     w1ts_ref, b1ts_ref, w2t_ref, b2t_ref, w2s_ref, b2s_ref,
                     o_ref):
    """Fused ICT forward: fused layer-1 -> teacher logits -> mixup (as data) ->
    student layer-2 -> softmax MSE loss. Only the (1,1) loss leaves VMEM.

    mix_ref: (B, B) f32, row i = lam*e_i + (1-lam)*e_{sigma(i)} for unlabeled
             rows, all-zeros for labeled rows (mask+perm+lam folded into data,
             so per-step changes never retrace/recompile this kernel).
    umask_ref: (B, 1) f32 unlabeled-row mask for the loss reduction.
    """
    hid = w2t_ref.shape[0]
    inv_b = 1.0 / x_ref.shape[0]

    xb = x_ref[...].astype(jnp.bfloat16)          # single bf16 cast of x
    mix = mix_ref[...]                            # (B, B) f32

    # Fused first layer: one K=D MXU pass over [w1_teacher | w1_student].
    h_pre = jnp.dot(xb, w1ts_ref[...],
                    preferred_element_type=jnp.float32) + b1ts_ref[...]   # (B, 2*HID)

    # Teacher branch: mean_teacher(x) on all B rows, exactly as the module.
    ht = jnp.maximum(h_pre[:, :hid], 0.0)
    yt = jnp.dot(ht.astype(jnp.bfloat16), w2t_ref[...],
                 preferred_element_type=jnp.float32) + b2t_ref[...]       # (B, NCLS)

    # Student branch: mixup applied to the first-layer pre-activations
    # (linearity of layer 1; exact f32 arithmetic since mix is f32 and sparse),
    # then ReLU and layer 2. Labeled rows are garbage-but-finite and masked out.
    hs = jnp.maximum(jnp.dot(mix, h_pre[:, hid:],
                             preferred_element_type=jnp.float32), 0.0)    # (B, HID)
    ys = jnp.dot(hs.astype(jnp.bfloat16), w2s_ref[...],
                 preferred_element_type=jnp.float32) + b2s_ref[...]       # (B, NCLS)

    # Mixed (detached) teacher targets: exact f32 row mixing via the mix matrix.
    yq = jnp.dot(mix, yt, preferred_element_type=jnp.float32)             # (B, NCLS)

    d = _softmax_rows(ys) - _softmax_rows(yq)
    per_row = jnp.sum(d * d, axis=1, keepdims=True)                       # (B, 1)
    # sum over classes and unlabeled rows, divide by the full batch size
    o_ref[...] = jnp.reshape(jnp.sum(umask_ref[...] * per_row) * inv_b, (1, 1))


def _build_mix_inputs(mask_np, perm_u, lam, b):
    """Host side: fold mask + permutation + lam into dense per-step *data*."""
    mask_np = np.asarray(mask_np, dtype=bool)
    u_idx = np.where(mask_np)[0]
    perm_u = np.asarray(perm_u)
    mix = np.zeros((b, b), dtype=np.float32)
    if u_idx.size:
        mix[u_idx, u_idx] += np.float32(lam)
        mix[u_idx, u_idx[perm_u]] += np.float32(1.0 - lam)
    u_mask = mask_np.astype(np.float32).reshape(b, 1)
    return jnp.asarray(mix), jnp.asarray(u_mask)


def ict_forward(x, mask_np, teacher_params, student_params, lam, perm_u):
    """Reproduces ICT.forward(x, y, model, mask) (y is unused in the reference)."""
    b = x.shape[0]
    x_flat = x.reshape(b, -1)

    w1t, b1t, w2t, b2t = teacher_params
    w1s, b1s, w2s, b2s = student_params
    # Fuse the two K=D first layers into one (D, 2*HID) bf16 weight:
    # one MXU push/drain, one contiguous weight DMA, 2x lane fill.
    w1ts = jnp.concatenate([w1t, w1s], axis=1)
    b1ts = jnp.concatenate([b1t, b1s], axis=1)

    mix, u_mask = _build_mix_inputs(mask_np, perm_u, lam, b)

    def full(shape):
        return pl.BlockSpec(shape, lambda i, s=shape: (0,) * len(s))

    out = pl.pallas_call(
        ict_fused_kernel,
        out_shape=jax.ShapeDtypeStruct((1, 1), jnp.float32),
        grid=(1,),
        in_specs=[full(x_flat.shape), full(mix.shape), full(u_mask.shape),
                  full(w1ts.shape), full(b1ts.shape),
                  full(w2t.shape), full(b2t.shape),
                  full(w2s.shape), full(b2s.shape)],
        out_specs=pl.BlockSpec((1, 1), lambda i: (0, 0)),
        compiler_params=pltpu.CompilerParams(
            dimension_semantics=("arbitrary",)),   # single TC; launch-bound kernel
    )(x_flat, mix, u_mask, w1ts, b1ts, w2t, b2t, w2s, b2s)
    return out[0, 0]


# Pure-JAX reference mirroring the PyTorch module structure (teacher on all
# rows, input-level mixup, labeled rows concatenated through the student and
# then dropped from the loss), with the same bf16 MXU cast points. The kernel
# additionally (a) mixes after the linear first layer and (b) uses an approx
# reciprocal in the softmax; both are sub-percent-level numerical deviations,
# hence the tolerance below.
def _ref_forward(x, mask_np, teacher_params, student_params, lam, perm_u):
    def mlp(xf, p):
        w1, b1, w2, b2 = p
        h = jnp.maximum(
            jnp.dot(xf.astype(jnp.bfloat16), w1,
                    preferred_element_type=jnp.float32) + b1, 0.0)
        return jnp.dot(h.astype(jnp.bfloat16), w2,
                       preferred_element_type=jnp.float32) + b2

    b = x.shape[0]
    xf = x.reshape(b, -1)
    mt_y = mlp(xf, teacher_params)
    mask_np = np.asarray(mask_np, dtype=bool)
    u_idx = np.where(mask_np)[0]
    l_idx = np.where(~mask_np)[0]
    u_x, u_y, l_x, l_y = xf[u_idx], mt_y[u_idx], xf[l_idx], mt_y[l_idx]
    perm_u = np.asarray(perm_u)
    mux = lam * u_x + (1 - lam) * u_x[perm_u]
    muy = lam * u_y + (1 - lam) * u_y[perm_u]
    y_hat = mlp(jnp.concatenate([l_x, mux], 0), student_params)
    tgt = jnp.concatenate([l_y, muy], 0)
    p = jax.nn.softmax(y_hat, axis=1)
    q = jax.nn.softmax(tgt, axis=1)
    per = jnp.sum((p - q) ** 2, axis=1)
    return jnp.sum(per[l_x.shape[0]:]) / b


if __name__ == "__main__":
    key = jax.random.PRNGKey(0)
    kx, kt1, kt2, ks1, ks2 = jax.random.split(key, 5)

    x = jax.random.normal(kx, (B, C, H, W), dtype=jnp.float32)
    # mask == 1 -> unlabeled, mask == 0 -> labeled (deterministic)
    mask_np = np.array([0, 1, 0, 1, 1, 0, 1, 0], dtype=bool)

    def init_params(k1, k2):
        # Weights stored in bf16 (MXU operands); biases stay f32.
        w1 = (jax.random.normal(k1, (D, HID), jnp.float32) * 0.05).astype(jnp.bfloat16)
        b1 = jnp.zeros((1, HID), jnp.float32)
        w2 = (jax.random.normal(k2, (HID, NCLS), jnp.float32) * 0.05).astype(jnp.bfloat16)
        b2 = jnp.zeros((1, NCLS), jnp.float32)
        return (w1, b1, w2, b2)

    teacher_params = init_params(kt1, kt2)   # mean_teacher (EMA copy)
    student_params = init_params(ks1, ks2)   # model

    # deterministic stand-ins for np.random.beta / torch.randperm
    rng = np.random.default_rng(0)
    lam = float(rng.beta(ALPHA, ALPHA))
    perm_u = rng.permutation(int(mask_np.sum()))

    loss = ict_forward(x, mask_np, teacher_params, student_params, lam, perm_u)
    loss = jax.block_until_ready(loss)

    ref = _ref_forward(x, mask_np, teacher_params, student_params, lam, perm_u)
    # Tolerance covers bf16 rounding-order change from post-layer-1 mixing and
    # the approx softmax reciprocal (both << 1% of the loss value).
    np.testing.assert_allclose(np.asarray(loss), np.asarray(ref),
                               rtol=2e-2, atol=1e-4)

    print("KERNEL_OK")
</pallas_src>

<mosaic_0001>
module attributes {stable_mosaic.version = 11 : i64} {
  func.func @ict_fused_kernel(%arg0: i32, %arg1: memref<8x1024xf32, #tpu.memory_space<vmem>>, %arg2: memref<8x8xf32, #tpu.memory_space<vmem>>, %arg3: memref<8x1xf32, #tpu.memory_space<vmem>>, %arg4: memref<1024x64xbf16, #tpu.memory_space<vmem>>, %arg5: memref<1x64xf32, #tpu.memory_space<vmem>>, %arg6: memref<32x10xbf16, #tpu.memory_space<vmem>>, %arg7: memref<1x10xf32, #tpu.memory_space<vmem>>, %arg8: memref<32x10xbf16, #tpu.memory_space<vmem>>, %arg9: memref<1x10xf32, #tpu.memory_space<vmem>>, %arg10: memref<1x1xf32, #tpu.memory_space<vmem>>) attributes {dimension_semantics = [#tpu.dimension_semantics<arbitrary>], iteration_bounds = array<i64: 1>, scalar_prefetch = 0 : i64, scratch_operands = 0 : i64, tpu.core_type = #tpu.core_type<tc>, window_params = [{pipeline_mode = #tpu.pipeline_mode<synchronous>, transform_indices = @transform_0, window_bounds = array<i64: 8, 1024>}, {pipeline_mode = #tpu.pipeline_mode<synchronous>, transform_indices = @transform_1, window_bounds = array<i64: 8, 8>}, {pipeline_mode = #tpu.pipeline_mode<synchronous>, transform_indices = @transform_2, window_bounds = array<i64: 8, 1>}, {pipeline_mode = #tpu.pipeline_mode<synchronous>, transform_indices = @transform_3, window_bounds = array<i64: 1024, 64>}, {pipeline_mode = #tpu.pipeline_mode<synchronous>, transform_indices = @transform_4, window_bounds = array<i64: 1, 64>}, {pipeline_mode = #tpu.pipeline_mode<synchronous>, transform_indices = @transform_5, window_bounds = array<i64: 32, 10>}, {pipeline_mode = #tpu.pipeline_mode<synchronous>, transform_indices = @transform_6, window_bounds = array<i64: 1, 10>}, {pipeline_mode = #tpu.pipeline_mode<synchronous>, transform_indices = @transform_7, window_bounds = array<i64: 32, 10>}, {pipeline_mode = #tpu.pipeline_mode<synchronous>, transform_indices = @transform_8, window_bounds = array<i64: 1, 10>}, {pipeline_mode = #tpu.pipeline_mode<synchronous>, transform_indices = @transform_9, window_bounds = array<i64: 1, 1>}]} {
    %c0 = arith.constant 0 : index
    %c0_0 = arith.constant 0 : index
    %0 = vector.load %arg1[%c0, %c0_0] : memref<8x1024xf32, #tpu.memory_space<vmem>>, vector<8x1024xf32>
    %1 = arith.truncf %0 : vector<8x1024xf32> to vector<8x1024xbf16>
    %c0_1 = arith.constant 0 : index
    %c0_2 = arith.constant 0 : index
    %2 = vector.load %arg2[%c0_1, %c0_2] : memref<8x8xf32, #tpu.memory_space<vmem>>, vector<8x8xf32>
    %c0_3 = arith.constant 0 : index
    %c0_4 = arith.constant 0 : index
    %3 = vector.load %arg4[%c0_3, %c0_4] : memref<1024x64xbf16, #tpu.memory_space<vmem>>, vector<1024x64xbf16>
    %cst = arith.constant dense<0.000000e+00> : vector<8x64xf32>
    %4 = tpu.matmul %1, %3, %cst {dimension_numbers = #tpu.dot_dimension_numbers<[1], [0], [0], [1], [0, 0, 1, 1], [], []>} : vector<8x1024xbf16>, vector<1024x64xbf16>, vector<8x64xf32> -> vector<8x64xf32>
    %c0_5 = arith.constant 0 : index
    %c0_6 = arith.constant 0 : index
    %5 = vector.load %arg5[%c0_5, %c0_6] : memref<1x64xf32, #tpu.memory_space<vmem>>, vector<1x64xf32>
    %6 = vector.broadcast %5 : vector<1x64xf32> to vector<8x64xf32>
    %7 = arith.addf %4, %6 : vector<8x64xf32>
    %8 = vector.extract_strided_slice %7 {offsets = [0, 0], sizes = [8, 32], strides = [1, 1]} : vector<8x64xf32> to vector<8x32xf32>
    %cst_7 = arith.constant 0.000000e+00 : f32
    %9 = vector.broadcast %cst_7 : f32 to vector<8x32xf32>
    %10 = arith.maximumf %8, %9 : vector<8x32xf32>
    %11 = arith.truncf %10 : vector<8x32xf32> to vector<8x32xbf16>
    %c0_8 = arith.constant 0 : index
    %c0_9 = arith.constant 0 : index
    %12 = vector.load %arg6[%c0_8, %c0_9] : memref<32x10xbf16, #tpu.memory_space<vmem>>, vector<32x10xbf16>
    %cst_10 = arith.constant dense<0.000000e+00> : vector<8x10xf32>
    %13 = tpu.matmul %11, %12, %cst_10 {dimension_numbers = #tpu.dot_dimension_numbers<[1], [0], [0], [1], [0, 0, 1, 1], [], []>} : vector<8x32xbf16>, vector<32x10xbf16>, vector<8x10xf32> -> vector<8x10xf32>
    %c0_11 = arith.constant 0 : index
    %c0_12 = arith.constant 0 : index
    %14 = vector.load %arg7[%c0_11, %c0_12] : memref<1x10xf32, #tpu.memory_space<vmem>>, vector<1x10xf32>
    %15 = vector.broadcast %14 : vector<1x10xf32> to vector<8x10xf32>
    %16 = arith.addf %13, %15 : vector<8x10xf32>
    %17 = vector.extract_strided_slice %7 {offsets = [0, 32], sizes = [8, 32], strides = [1, 1]} : vector<8x64xf32> to vector<8x32xf32>
    %cst_13 = arith.constant dense<0.000000e+00> : vector<8x32xf32>
    %18 = tpu.matmul %2, %17, %cst_13 {dimension_numbers = #tpu.dot_dimension_numbers<[1], [0], [0], [1], [0, 0, 1, 1], [], []>} : vector<8x8xf32>, vector<8x32xf32>, vector<8x32xf32> -> vector<8x32xf32>
    %cst_14 = arith.constant 0.000000e+00 : f32
    %19 = vector.broadcast %cst_14 : f32 to vector<8x32xf32>
    %20 = arith.maximumf %18, %19 : vector<8x32xf32>
    %21 = arith.truncf %20 : vector<8x32xf32> to vector<8x32xbf16>
    %c0_15 = arith.constant 0 : index
    %c0_16 = arith.constant 0 : index
    %22 = vector.load %arg8[%c0_15, %c0_16] : memref<32x10xbf16, #tpu.memory_space<vmem>>, vector<32x10xbf16>
    %cst_17 = arith.constant dense<0.000000e+00> : vector<8x10xf32>
    %23 = tpu.matmul %21, %22, %cst_17 {dimension_numbers = #tpu.dot_dimension_numbers<[1], [0], [0], [1], [0, 0, 1, 1], [], []>} : vector<8x32xbf16>, vector<32x10xbf16>, vector<8x10xf32> -> vector<8x10xf32>
    %c0_18 = arith.constant 0 : index
    %c0_19 = arith.constant 0 : index
    %24 = vector.load %arg9[%c0_18, %c0_19] : memref<1x10xf32, #tpu.memory_space<vmem>>, vector<1x10xf32>
    %25 = vector.broadcast %24 : vector<1x10xf32> to vector<8x10xf32>
    %26 = arith.addf %23, %25 : vector<8x10xf32>
    %cst_20 = arith.constant dense<0.000000e+00> : vector<8x10xf32>
    %27 = tpu.matmul %2, %16, %cst_20 {dimension_numbers = #tpu.dot_dimension_numbers<[1], [0], [0], [1], [0, 0, 1, 1], [], []>} : vector<8x8xf32>, vector<8x10xf32>, vector<8x10xf32> -> vector<8x10xf32>
    %cst_21 = arith.constant dense<0xFF800000> : vector<8xf32>
    %28 = vector.multi_reduction <maximumf>, %26, %cst_21 [1] : vector<8x10xf32> to vector<8xf32>
    %29 = vector.shape_cast %28 : vector<8xf32> to vector<8x1xf32>
    %30 = vector.broadcast %29 : vector<8x1xf32> to vector<8x10xf32>
    %31 = arith.subf %26, %30 : vector<8x10xf32>
    %32 = math.exp %31 : vector<8x10xf32>
    %cst_22 = arith.constant dense<0.000000e+00> : vector<8xf32>
    %33 = vector.multi_reduction <add>, %32, %cst_22 [1] : vector<8x10xf32> to vector<8xf32>
    %34 = vector.shape_cast %33 : vector<8xf32> to vector<8x1xf32>
    %35 = tpu.reciprocal %34 {approx = true} : vector<8x1xf32> -> vector<8x1xf32>
    %36 = vector.broadcast %35 : vector<8x1xf32> to vector<8x10xf32>
    %37 = arith.mulf %32, %36 : vector<8x10xf32>
    %cst_23 = arith.constant dense<0xFF800000> : vector<8xf32>
    %38 = vector.multi_reduction <maximumf>, %27, %cst_23 [1] : vector<8x10xf32> to vector<8xf32>
    %39 = vector.shape_cast %38 : vector<8xf32> to vector<8x1xf32>
    %40 = vector.broadcast %39 : vector<8x1xf32> to vector<8x10xf32>
    %41 = arith.subf %27, %40 : vector<8x10xf32>
    %42 = math.exp %41 : vector<8x10xf32>
    %cst_24 = arith.constant dense<0.000000e+00> : vector<8xf32>
    %43 = vector.multi_reduction <add>, %42, %cst_24 [1] : vector<8x10xf32> to vector<8xf32>
    %44 = vector.shape_cast %43 : vector<8xf32> to vector<8x1xf32>
    %45 = tpu.reciprocal %44 {approx = true} : vector<8x1xf32> -> vector<8x1xf32>
    %46 = vector.broadcast %45 : vector<8x1xf32> to vector<8x10xf32>
    %47 = arith.mulf %42, %46 : vector<8x10xf32>
    %48 = arith.subf %37, %47 : vector<8x10xf32>
    %49 = arith.mulf %48, %48 : vector<8x10xf32>
    %cst_25 = arith.constant dense<0.000000e+00> : vector<8xf32>
    %50 = vector.multi_reduction <add>, %49, %cst_25 [1] : vector<8x10xf32> to vector<8xf32>
    %51 = vector.shape_cast %50 : vector<8xf32> to vector<8x1xf32>
    %c0_26 = arith.constant 0 : index
    %c0_27 = arith.constant 0 : index
    %52 = vector.load %arg3[%c0_26, %c0_27] : memref<8x1xf32, #tpu.memory_space<vmem>>, vector<8x1xf32>
    %53 = arith.mulf %52, %51 : vector<8x1xf32>
    %54 = vector.shape_cast %53 : vector<8x1xf32> to vector<1x8x1xf32>
    %cst_28 = arith.constant dense<0.000000e+00> : vector<1xf32>
    %55 = vector.multi_reduction <add>, %54, %cst_28 [1, 2] : vector<1x8x1xf32> to vector<1xf32>
    %56 = vector.shape_cast %55 : vector<1xf32> to vector<1x1x1xf32>
    %57 = vector.extract %56[0, 0, 0] : f32 from vector<1x1x1xf32>
    %cst_29 = arith.constant 1.250000e-01 : f32
    %58 = arith.mulf %57, %cst_29 : f32
    %59 = vector.broadcast %58 : f32 to vector<1x1xf32>
    %c0_30 = arith.constant 0 : index
    %c0_31 = arith.constant 0 : index
    %60 = vector.load %arg10[%c0_30, %c0_31] : memref<1x1xf32, #tpu.memory_space<vmem>>, vector<1x1xf32>
    tpu.vector_store %arg10[%c0_30, %c0_31], %59 {strides = array<i32>} : memref<1x1xf32, #tpu.memory_space<vmem>>, vector<1x1xf32>,
    return
  }
  func.func @transform_0(%arg0: i32) -> (i32, i32) {
    %c0_i32 = arith.constant 0 : i32
    %c0_i32_0 = arith.constant 0 : i32
    %c0_i32_1 = arith.constant 0 : i32
    return %c0_i32, %c0_i32_0 : i32, i32
  }
  func.func @transform_1(%arg0: i32) -> (i32, i32) {
    %c0_i32 = arith.constant 0 : i32
    %c0_i32_0 = arith.constant 0 : i32
    %c0_i32_1 = arith.constant 0 : i32
    return %c0_i32, %c0_i32_0 : i32, i32
  }
  func.func @transform_2(%arg0: i32) -> (i32, i32) {
    %c0_i32 = arith.constant 0 : i32
    %c0_i32_0 = arith.constant 0 : i32
    %c0_i32_1 = arith.constant 0 : i32
    return %c0_i32, %c0_i32_0 : i32, i32
  }
  func.func @transform_3(%arg0: i32) -> (i32, i32) {
    %c0_i32 = arith.constant 0 : i32
    %c0_i32_0 = arith.constant 0 : i32
    %c0_i32_1 = arith.constant 0 : i32
    return %c0_i32, %c0_i32_0 : i32, i32
  }
  func.func @transform_4(%arg0: i32) -> (i32, i32) {
    %c0_i32 = arith.constant 0 : i32
    %c0_i32_0 = arith.constant 0 : i32
    %c0_i32_1 = arith.constant 0 : i32
    return %c0_i32, %c0_i32_0 : i32, i32
  }
  func.func @transform_5(%arg0: i32) -> (i32, i32) {
    %c0_i32 = arith.constant 0 : i32
    %c0_i32_0 = arith.constant 0 : i32
    %c0_i32_1 = arith.constant 0 : i32
    return %c0_i32, %c0_i32_0 : i32, i32
  }
  func.func @transform_6(%arg0: i32) -> (i32, i32) {
    %c0_i32 = arith.constant 0 : i32
    %c0_i32_0 = arith.constant 0 : i32
    %c0_i32_1 = arith.constant 0 : i32
    return %c0_i32, %c0_i32_0 : i32, i32
  }
  func.func @transform_7(%arg0: i32) -> (i32, i32) {
    %c0_i32 = arith.constant 0 : i32
    %c0_i32_0 = arith.constant 0 : i32
    %c0_i32_1 = arith.constant 0 : i32
    return %c0_i32, %c0_i32_0 : i32, i32
  }
  func.func @transform_8(%arg0: i32) -> (i32, i32) {
    %c0_i32 = arith.constant 0 : i32
    %c0_i32_0 = arith.constant 0 : i32
    %c0_i32_1 = arith.constant 0 : i32
    return %c0_i32, %c0_i32_0 : i32, i32
  }
  func.func @transform_9(%arg0: i32) -> (i32, i32) {
    %c0_i32 = arith.constant 0 : i32
    %c0_i32_0 = arith.constant 0 : i32
    %c0_i32_1 = arith.constant 0 : i32
    return %c0_i32, %c0_i32_0 : i32, i32
  }
}

</mosaic_0001>

<bundles_post_ra>
// kernel: tpu_custom_call.1
= control target key start
LH: loop header
LB: loop body
LE: loop exit
PB: predicated region body
PF: predicated region fallthrough
CT: control target
= control target key end

     0   :  { %s1547_s0 = inlined_call_operand.vmem [shape: f32[8,1024], index: 0, kind: input, shape index: {}]   ;;  %s1548_s1 = inlined_call_operand.vmem [shape: f32[8,8], index: 1, kind: input, shape index: {}]   ;;  %s1549_s2 = inlined_call_operand.vmem [shape: f32[8,1], index: 2, kind: input, shape index: {}]   ;;  %s1550_s3 = inlined_call_operand.vmem [shape: bf16[1024,64], index: 3, kind: input, shape index: {}]   ;;  %s1551_s4 = inlined_call_operand.vmem [shape: f32[1,64], index: 4, kind: input, shape index: {}]   ;;  %s1552_s5 = inlined_call_operand.vmem [shape: bf16[32,10], index: 5, kind: input, shape index: {}]   ;;  %s1553_s6 = inlined_call_operand.vmem [shape: f32[1,10], index: 6, kind: input, shape index: {}]   ;;  %s1554_s7 = inlined_call_operand.vmem [shape: bf16[32,10], index: 7, kind: input, shape index: {}]   ;;  %s1555_s8 = inlined_call_operand.vmem [shape: f32[1,10], index: 8, kind: input, shape index: {}]   ;;  %s1556_s9 = inlined_call_operand.hbm [shape: f32[1,1], index: 9, kind: output, shape index: {}]  }
   0x1   :  { %v1140_v0 = vld [vmem:[%s1550_s3 + $0x38] sm:$0xff]  ;;  %v1139_v4 = vld [vmem:[%s1550_s3 + $0x30] sm:$0xff]  ;;  %v1138_v8 = vld [vmem:[%s1550_s3 + $0x28] sm:$0xff] }
   0x2   :  { %v1148_v1 = vld [vmem:[%s1550_s3 + $0x78] sm:$0xff]  ;;  %567 = vmatpush.bf16.msra.mxu0 %v1140_v0  ;;  %v1147_v5 = vld [vmem:[%s1550_s3 + $0x70] sm:$0xff]  ;;  %v1146_v9 = vld [vmem:[%s1550_s3 + $0x68] sm:$0xff] }
   0x3   :  { %v1156_v2 = vld [vmem:[%s1550_s3 + $0xb8] sm:$0xff]  ;;  %580 = vmatpush.bf16.msra.mxu1 %v1148_v1  ;;  %v1155_v6 = vld [vmem:[%s1550_s3 + $0xb0] sm:$0xff]  ;;  %v1154_v10 = vld [vmem:[%s1550_s3 + $0xa8] sm:$0xff] }
   0x4   :  { %v1164_v3 = vld [vmem:[%s1550_s3 + $0xf8] sm:$0xff]  ;;  %593 = vmatpush.bf16.msra.mxu2 %v1156_v2  ;;  %v1163_v7 = vld [vmem:[%s1550_s3 + $0xf0] sm:$0xff]  ;;  %v1162_v11 = vld [vmem:[%s1550_s3 + $0xe8] sm:$0xff] }
   0x5   :  { %606 = vmatpush.bf16.msra.mxu3 %v1164_v3  ;;  %v1137_v12 = vld [vmem:[%s1550_s3 + $0x20] sm:$0xff]  ;;  %v1136_v16 = vld [vmem:[%s1550_s3 + $0x18] sm:$0xff]  ;;  %v1135_v20 = vld [vmem:[%s1550_s3 + $0x10] sm:$0xff] }
   0x6   :  { %568 = vmatpush.bf16.msra.mxu0 %v1139_v4  ;;  %v1145_v13 = vld [vmem:[%s1550_s3 + $0x60] sm:$0xff]  ;;  %v1144_v17 = vld [vmem:[%s1550_s3 + $0x58] sm:$0xff]  ;;  %v1143_v21 = vld [vmem:[%s1550_s3 + $0x50] sm:$0xff] }
   0x7   :  { %581 = vmatpush.bf16.msra.mxu1 %v1147_v5  ;;  %v1153_v14 = vld [vmem:[%s1550_s3 + $0xa0] sm:$0xff]  ;;  %v1152_v18 = vld [vmem:[%s1550_s3 + $0x98] sm:$0xff]  ;;  %v1151_v22 = vld [vmem:[%s1550_s3 + $0x90] sm:$0xff] }
   0x8   :  { %594 = vmatpush.bf16.msra.mxu2 %v1155_v6  ;;  %v1161_v15 = vld [vmem:[%s1550_s3 + $0xe0] sm:$0xff]  ;;  %v1160_v19 = vld [vmem:[%s1550_s3 + $0xd8] sm:$0xff]  ;;  %v1159_v23 = vld [vmem:[%s1550_s3 + $0xd0] sm:$0xff] }
   0x9   :  { %607 = vmatpush.bf16.msra.mxu3 %v1163_v7 }
   0xa   :  { %569 = vmatpush.bf16.msra.mxu0 %v1138_v8 }
   0xb   :  { %582 = vmatpush.bf16.msra.mxu1 %v1146_v9 }
   0xc   :  { %595 = vmatpush.bf16.msra.mxu2 %v1154_v10 }
   0xd   :  { %608 = vmatpush.bf16.msra.mxu3 %v1162_v11 }
   0xe   :  { %570 = vmatpush.bf16.msra.mxu0 %v1137_v12 }
   0xf   :  { %583 = vmatpush.bf16.msra.mxu1 %v1145_v13 }
  0x10   :  { %596 = vmatpush.bf16.msra.mxu2 %v1153_v14 }
  0x11   :  { %609 = vmatpush.bf16.msra.mxu3 %v1161_v15 }
  0x12   :  { %571 = vmatpush.bf16.msra.mxu0 %v1136_v16 }
  0x13   :  { %584 = vmatpush.bf16.msra.mxu1 %v1144_v17 }
  0x14   :  { %597 = vmatpush.bf16.msra.mxu2 %v1152_v18 }
  0x15   :  { %610 = vmatpush.bf16.msra.mxu3 %v1160_v19 }
  0x16   :  { %14 = vsyncpa [#allocation3], 0  ;;  %572 = vmatpush.bf16.msra.mxu0 %v1135_v20  ;;  %v1134_v24 = vld [vmem:[%s1550_s3 + $0x8] sm:$0xff]  ;;  %v1133_v28 = vld [vmem:[%s1550_s3] sm:$0xff]  ;;  %vm693_vm0 = vcmask 261120   ;;  %vm714_vm1 = vcmask 64512  }
  0x17   :  { %585 = vmatpush.bf16.msra.mxu1 %v1143_v21  ;;  %v1142_v25 = vld [vmem:[%s1550_s3 + $0x48] sm:$0xff]  ;;  %v1141_v29 = vld [vmem:[%s1550_s3 + $0x40] sm:$0xff]  ;;  %v1172_v32 = vld [vmem:[%s1550_s3 + $0x138] sm:$0xff]  ;;  %vm796_vm2 = vcmask 80896   ;;  %vm826_vm3 = vcmask 7168   ;;  %s1243_s17 = smov [#allocation2]  }
  0x18   :  { %598 = vmatpush.bf16.msra.mxu2 %v1151_v22  ;;  %v1150_v26 = vld [vmem:[%s1550_s3 + $0x88] sm:$0xff]  ;;  %v1149_v30 = vld [vmem:[%s1550_s3 + $0x80] sm:$0xff]  ;;  %v36_v33 = vld [vmem:[%s1547_s0 + $0x10] sm:$0xff]  ;;  %s846_s18 = sshll.u32 %s1243_s17, 4  ;;  %s848_s21 = sshll.u32 %s1556_s9, 4  ;;  %vm839_vm4 = vcmask 0   ;;  %s847_s18 = int_to_ptr.vmem [resolvable:$true] %s846_s18  ;;  %s849_s21 = int_to_ptr.hbm [resolvable:$true] %s848_s21 }
  0x19   :  { %611 = vmatpush.bf16.msra.mxu3 %v1159_v23  ;;  %v1158_v27 = vld [vmem:[%s1550_s3 + $0xc8] sm:$0xff]  ;;  %v1157_v31 = vld [vmem:[%s1550_s3 + $0xc0] sm:$0xff]  ;;  %v1180_v35 = vld [vmem:[%s1550_s3 + $0x178] sm:$0xff]  ;;  %v44_v40 = vpack.c.bf16 %v36_v33, %v36_v33 }
  0x1a   :  { %573 = vmatpush.bf16.msra.mxu0 %v1134_v24  ;;  %v34_v34 = vld [vmem:[%s1547_s0] sm:$0xff]  ;;  %v37_v36 = vld [vmem:[%s1547_s0 + $0x18] sm:$0xff]  ;;  %v35_v37 = vld [vmem:[%s1547_s0 + $0x8] sm:$0xff] }
  0x1b   :  { %586 = vmatpush.bf16.msra.mxu1 %v1142_v25  ;;  %v1188_v38 = vld [vmem:[%s1550_s3 + $0x1b8] sm:$0xff]  ;;  %v42_v41 = vpack.c.bf16 %v34_v34, %v34_v34  ;;  %v45_v42 = vpack.c.bf16 %v37_v36, %v37_v36  ;;  %v43_v43 = vpack.c.bf16 %v35_v37, %v35_v37  ;;  %v1171_v44 = vld [vmem:[%s1550_s3 + $0x130] sm:$0xff]  ;;  %v1170_v48 = vld [vmem:[%s1550_s3 + $0x128] sm:$0xff] }
  0x1c   :  { %599 = vmatpush.bf16.msra.mxu2 %v1150_v26  ;;  %v1196_v39 = vld [vmem:[%s1550_s3 + $0x1f8] sm:$0xff]  ;;  %v1179_v45 = vld [vmem:[%s1550_s3 + $0x170] sm:$0xff]  ;;  %v1178_v49 = vld [vmem:[%s1550_s3 + $0x168] sm:$0xff] }
  0x1d   :  { %612 = vmatpush.bf16.msra.mxu3 %v1158_v27  ;;  %v1187_v46 = vld [vmem:[%s1550_s3 + $0x1b0] sm:$0xff]  ;;  %v1186_v50 = vld [vmem:[%s1550_s3 + $0x1a8] sm:$0xff]  ;;  %v1169_v52 = vld [vmem:[%s1550_s3 + $0x120] sm:$0xff] }
  0x1e   :  { %574 = vmatpush.bf16.msra.mxu0 %v1133_v28  ;;  %v1195_v47 = vld [vmem:[%s1550_s3 + $0x1f0] sm:$0xff]  ;;  %v1194_v51 = vld [vmem:[%s1550_s3 + $0x1e8] sm:$0xff]  ;;  %v1177_v53 = vld [vmem:[%s1550_s3 + $0x160] sm:$0xff] }
  0x1f   :  { %587 = vmatpush.bf16.msra.mxu1 %v1141_v29  ;;  %v1185_v54 = vld [vmem:[%s1550_s3 + $0x1a0] sm:$0xff]  ;;  %v1168_v56 = vld [vmem:[%s1550_s3 + $0x118] sm:$0xff]  ;;  %v1167_v60 = vld [vmem:[%s1550_s3 + $0x110] sm:$0xff] }
  0x20   :  { %600 = vmatpush.bf16.msra.mxu2 %v1149_v30  ;;  %v1193_v55 = vld [vmem:[%s1550_s3 + $0x1e0] sm:$0xff]  ;;  %v1176_v57 = vld [vmem:[%s1550_s3 + $0x158] sm:$0xff]  ;;  %v1175_v61 = vld [vmem:[%s1550_s3 + $0x150] sm:$0xff] }
  0x21   :  { %613 = vmatpush.bf16.msra.mxu3 %v1157_v31  ;;  %575 = vmatmul.bf16.vlgmr.msra.gmra.mxu0 %v42_v41  ;;  %v1184_v58 = vld [vmem:[%s1550_s3 + $0x198] sm:$0xff]  ;;  %v1183_v62 = vld [vmem:[%s1550_s3 + $0x190] sm:$0xff]  ;;  %v1166_v0 = vld [vmem:[%s1550_s3 + $0x108] sm:$0xff] }
  0x22   :  { %619 = vmatpush.bf16.msrb.mxu0 %v1172_v32  ;;  %588 = vmatmul.bf16.vlgmr.msra.gmra.mxu1 %v43_v43  ;;  %v1192_v59 = vld [vmem:[%s1550_s3 + $0x1d8] sm:$0xff]  ;;  %v1191_v63 = vld [vmem:[%s1550_s3 + $0x1d0] sm:$0xff]  ;;  %v1174_v1 = vld [vmem:[%s1550_s3 + $0x148] sm:$0xff] }
  0x23   :  { %632 = vmatpush.bf16.msrb.mxu1 %v1180_v35  ;;  %601 = vmatmul.bf16.vlgmr.msra.gmra.mxu2 %v44_v40  ;;  %v1182_v2 = vld [vmem:[%s1550_s3 + $0x188] sm:$0xff]  ;;  %v1165_v4 = vld [vmem:[%s1550_s3 + $0x100] sm:$0xff]  ;;  %v40_v10 = vld [vmem:[%s1547_s0 + $0x30] sm:$0xff] }
  0x24   :  { %645 = vmatpush.bf16.msrb.mxu2 %v1188_v38  ;;  %614 = vmatmul.bf16.vlgmr.msra.gmra.mxu3 %v45_v42  ;;  %v1190_v3 = vld [vmem:[%s1550_s3 + $0x1c8] sm:$0xff]  ;;  %v1173_v5 = vld [vmem:[%s1550_s3 + $0x140] sm:$0xff]  ;;  %v41_v11 = vld [vmem:[%s1547_s0 + $0x38] sm:$0xff]  ;;  %v48_v14 = vpack.c.bf16 %v40_v10, %v40_v10 }
  0x25   :  { %658 = vmatpush.bf16.msrb.mxu3 %v1196_v39  ;;  %v1181_v6 = vld [vmem:[%s1550_s3 + $0x180] sm:$0xff]  ;;  %v39_v8 = vld [vmem:[%s1547_s0 + $0x28] sm:$0xff]  ;;  %v49_v15 = vpack.c.bf16 %v41_v11, %v41_v11 }
  0x26   :  { %620 = vmatpush.bf16.msrb.mxu0 %v1171_v44  ;;  %v38_v7 = vld [vmem:[%s1547_s0 + $0x20] sm:$0xff]  ;;  %v47_v13 = vpack.c.bf16 %v39_v8, %v39_v8  ;;  %v1198_v18 = vld [vmem:[%s1552_s5 + $0x8] sm:$0xff] }
  0x27   :  { %633 = vmatpush.bf16.msrb.mxu1 %v1179_v45  ;;  %v1189_v9 = vld [vmem:[%s1550_s3 + $0x1c0] sm:$0xff]  ;;  %v46_v12 = vpack.c.bf16 %v38_v7, %v38_v7  ;;  %v1200_v45 = vld [vmem:[%s1554_s7 + $0x8] sm:$0xff] }
  0x28   :  { %646 = vmatpush.bf16.msrb.mxu2 %v1187_v46  ;;  %v1197_v22 = vld [vmem:[%s1552_s5] sm:$0xff]  ;;  %s1242_s5 = smov 96  }
  0x29   :  { %659 = vmatpush.bf16.msrb.mxu3 %v1195_v47  ;;  %v1205_v24 = vld [vmem:[%s1551_s4] ss:$0 sm:$0xff] }
  0x2a   :  { %621 = vmatpush.bf16.msrb.mxu0 %v1170_v48  ;;  %v50_v46 = vld [vmem:[%s1548_s1] sm:$0xff] }
  0x2b   :  { %634 = vmatpush.bf16.msrb.mxu1 %v1178_v49  ;;  %v1206_v48 = vld [vmem:[%s1553_s6] ss:$0 sm:$0xff] }
  0x2c   :  { %647 = vmatpush.bf16.msrb.mxu2 %v1186_v50 }
  0x2d   :  { %660 = vmatpush.bf16.msrb.mxu3 %v1194_v51 }
  0x2e   :  { %622 = vmatpush.bf16.msrb.mxu0 %v1169_v52  ;;  %v1199_v52 = vld [vmem:[%s1554_s7] sm:$0xff] }
  0x2f   :  { %635 = vmatpush.bf16.msrb.mxu1 %v1177_v53 }
  0x30   :  { %648 = vmatpush.bf16.msrb.mxu2 %v1185_v54 }
  0x31   :  { %661 = vmatpush.bf16.msrb.mxu3 %v1193_v55 }
  0x32   :  { %623 = vmatpush.bf16.msrb.mxu0 %v1168_v56 }
  0x33   :  { %636 = vmatpush.bf16.msrb.mxu1 %v1176_v57 }
  0x34   :  { %649 = vmatpush.bf16.msrb.mxu2 %v1184_v58  ;;  %v1207_v58 = vld [vmem:[%s1555_s8] ss:$0 sm:$0xff] }
  0x35   :  { %662 = vmatpush.bf16.msrb.mxu3 %v1192_v59 }
  0x36   :  { %624 = vmatpush.bf16.msrb.mxu0 %v1167_v60 }
  0x37   :  { %637 = vmatpush.bf16.msrb.mxu1 %v1175_v61 }
  0x38   :  { %650 = vmatpush.bf16.msrb.mxu2 %v1183_v62 }
  0x39   :  { %663 = vmatpush.bf16.msrb.mxu3 %v1191_v63 }
  0x3a   :  { %625 = vmatpush.bf16.msrb.mxu0 %v1166_v0 }
  0x3b   :  { %638 = vmatpush.bf16.msrb.mxu1 %v1174_v1 }
  0x3c   :  { %651 = vmatpush.bf16.msrb.mxu2 %v1182_v2 }
  0x3d   :  { %664 = vmatpush.bf16.msrb.mxu3 %v1190_v3 }
  0x3e   :  { %626 = vmatpush.bf16.msrb.mxu0 %v1165_v4 }
  0x3f   :  { %639 = vmatpush.bf16.msrb.mxu1 %v1173_v5 }
  0x40   :  { %652 = vmatpush.bf16.msrb.mxu2 %v1181_v6 }
  0x41   :  { %665 = vmatpush.bf16.msrb.mxu3 %v1189_v9  ;;  %627 = vmatmul.bf16.vlgmr.msrb.gmra.mxu0 %v46_v12 }
  0x42   :  { %640 = vmatmul.bf16.vlgmr.msrb.gmra.mxu1 %v47_v13  ;;  %703 = vmatpush.bf16.msra.mxu0 %v1198_v18  ;;  %v824_v18 = vld [vmem:[%s1549_s2] sm:$0xff] }
  0x43   :  { %653 = vmatmul.bf16.vlgmr.msrb.gmra.mxu2 %v48_v14 }
  0x44   :  { %666 = vmatmul.bf16.vlgmr.msrb.gmra.mxu3 %v49_v15  ;;  %769 = vmatpush.bf16.msra.mxu2 %v1200_v45 }
  0x46   :  { %704 = vmatpush.bf16.msra.mxu0 %v1197_v22 }
  0x48   :  { %770 = vmatpush.bf16.msra.mxu2 %v1199_v52 }
  0x9e   :  { %v576_v16 = vpop.f32.mrf.mxu0 }
  0x9f   :  { %v589_v17 = vpop.f32.mrf.mxu1  ;;  %v577_v27 = vadd.f32 %v1205_v24, %v576_v16 }
  0xa1   :  { %v590_v28 = vadd.f32 %v589_v17, %v577_v27 }
  0xa6   :  { %v602_v19 = vpop.f32.mrf.mxu2  ;;  %v578_v21 = vpop.f32.mrf.mxu0 }
  0xa7   :  { %v615_v20 = vpop.f32.mrf.mxu3  ;;  %v591_v23 = vpop.f32.mrf.mxu1  ;;  %v603_v29 = vadd.f32 %v602_v19, %v590_v28 }
  0xa9   :  { %v616_v30 = vadd.f32 %v615_v20, %v603_v29 }
  0xae   :  { %v604_v25 = vpop.f32.mrf.mxu2 }
  0xaf   :  { %v617_v26 = vpop.f32.mrf.mxu3 }
  0xbe   :  { %v628_v31 = vpop.f32.mrf.mxu0 }
  0xbf   :  { %v641_v32 = vpop.f32.mrf.mxu1  ;;  %v629_v33 = vadd.f32 %v628_v31, %v616_v30 }
  0xc1   :  { %v642_v34 = vadd.f32 %v641_v32, %v629_v33 }
  0xc6   :  { %v654_v35 = vpop.f32.mrf.mxu2  ;;  %v630_v38 = vpop.f32.mrf.mxu0 }
  0xc7   :  { %v667_v36 = vpop.f32.mrf.mxu3  ;;  %v655_v37 = vadd.f32 %v654_v35, %v642_v34  ;;  %v643_v39 = vpop.f32.mrf.mxu1 }
  0xc9   :  { %v668_v40 = vadd.f32 %v667_v36, %v655_v37 }
  0xcb   :  { %v671_v41 = vmax.f32 %v668_v40, 0.0  ;;  %711 = vrot.lane.b32.xlu0 %v668_v40, %s1242_s5 }
  0xcd   :  { %v672_v42 = vpack.c.bf16 %v671_v41, %v671_v41 }
  0xce   :  { %v656_v43 = vpop.f32.mrf.mxu2 }
  0xcf   :  { %v669_v44 = vpop.f32.mrf.mxu3  ;;  %1121 = vmatmul.msk.bf16.vlgmr.msra.gmra.mxu0 %vm693_vm0, %v672_v42 }
 0x13d   :  { %v712_v47 = vpop.permute.xlu0 %711 }
 0x13e   :  { %733 = vmatpush.msra.mxu1 %v712_v47 }
 0x13f   :  { %1122 = vmatmul.msk.f32.vlgmr.msra.gmra.mxu1 %vm714_vm1, %v50_v46 }
 0x14c   :  { %v706_v49 = vpop.f32.mrf.mxu0 }
 0x14d   :  { %v707_v50 = vadd.f32 %v1206_v48, %v706_v49 }
 0x14f   :  { %791 = vmatpush.msra.mxu3 %v707_v50 }
 0x150   :  { %1132 = vmatmul.msk.f32.vlgmr.msra.gmra.mxu3 %vm714_vm1, %v50_v46 }
 0x154   :  { %v708_v51 = vpop.f32.mrf.mxu0 }
 0x1bc   :  { %v735_v53 = vpop.f32.mrf.mxu1 }
 0x1bd   :  { %v738_v54 = vmax.f32 %v735_v53, 0.0 }
 0x1bf   :  { %v739_v55 = vpack.c.bf16 %v738_v54, %v738_v54 }
 0x1c1   :  { %1131 = vmatmul.msk.bf16.vlgmr.msra.gmra.mxu2 %vm693_vm0, %v739_v55 }
 0x1d3   :  { %v793_v56 = vpop.f32.mrf.mxu3 }
 0x1d4   :  { %v808_v57 = vsel %vm796_vm2, %v793_v56, -inf }
 0x1d5   :  { %809 = vmax.xlane.f32.xlu1 %v808_v57 }
 0x244   :  { %v772_v59 = vpop.f32.mrf.mxu2 }
 0x245   :  { %v773_v60 = vadd.f32 %v1207_v58, %v772_v59 }
 0x247   :  { %v797_v61 = vsel %vm796_vm2, %v773_v60, -inf }
 0x248   :  { %798 = vmax.xlane.f32.xlu0 %v797_v61  ;;  %v810_v62 = vpop.xlane.xlu1 %809 }
 0x249   :  { %v811_v63 = vsub.f32 %v793_v56, %v810_v62 }
 0x24b   :  { %v812_v0 = vmul.f32 1.442695, %v811_v63 }
 0x24c   :  { %v774_v1 = vpop.f32.mrf.mxu2 }
 0x24d   :  { %1208 = vpow2.f32 %v812_v0 }
 0x253   :  { %v1209_v2 = vpop.eup %1208 }
 0x254   :  { %v814_v3 = vsel %vm796_vm2, %v1209_v2, 0.0 }
 0x255   :  { %815 = vadd.xlane.f32.xlu2 %v814_v3 }
 0x2bb   :  { %v799_v4 = vpop.xlane.xlu0 %798 }
 0x2bc   :  { %v800_v5 = vsub.f32 %v773_v60, %v799_v4 }
 0x2be   :  { %v801_v6 = vmul.f32 1.442695, %v800_v5 }
 0x2c0   :  { %1210 = vpow2.f32 %v801_v6 }
 0x2c6   :  { %v1211_v7 = vpop.eup %1210 }
 0x2c7   :  { %v803_v8 = vsel %vm796_vm2, %v1211_v7, 0.0 }
 0x2c8   :  { %804 = vadd.xlane.f32.xlu1 %v803_v8  ;;  %v816_v9 = vpop.xlane.xlu2 %815 }
 0x2c9   :  { %1212 = vrcp.f32 %v816_v9 }
 0x2cf   :  { %v1213_v11 = vpop.eup %1212 }
 0x2d0   :  { %v818_v14 = vmul.f32 %v1213_v11, %v1209_v2 }
 0x33b   :  { %v805_v10 = vpop.xlane.xlu1 %804 }
 0x33c   :  { %1214 = vrcp.f32 %v805_v10 }
 0x342   :  { %v1215_v12 = vpop.eup %1214 }
 0x343   :  { %v807_v13 = vmul.f32 %v1215_v12, %v1211_v7 }
 0x345   :  { %v819_v15 = vsub.f32 %v807_v13, %v818_v14 }
 0x347   :  { %v820_v16 = vmul.f32 %v819_v15, %v819_v15 }
 0x349   :  { %v821_v17 = vsel %vm796_vm2, %v820_v16, 0.0 }
 0x34a   :  { %822 = vadd.xlane.f32.xlu2 %v821_v17 }
 0x3bd   :  { %v823_v19 = vpop.xlane.xlu2 %822 }
 0x3be   :  { %v825_v20 = vmul.f32 %v824_v18, %v823_v19 }
 0x3c0   :  { %v827_v21 = vsel %vm826_vm3, %v825_v20, 0.0 }
 0x3c1   :  { %828 = vadd.xlane.f32.xlu1 %v827_v21 }
 0x434   :  { %v829_v22 = vpop.xlane.xlu1 %828 }
 0x435   :  { %v830_v23 = vrot.slane %v829_v22, 4 }
 0x437   :  { %v831_v24 = vadd.f32 %v830_v23, %v829_v22 }
 0x439   :  { %v832_v25 = vrot.slane %v831_v24, 2 }
 0x43b   :  { %v833_v26 = vadd.f32 %v832_v25, %v831_v24 }
 0x43d   :  { %v834_v27 = vrot.slane %v833_v26, 1 }
 0x43f   :  { %v835_v28 = vadd.f32 %v834_v27, %v833_v26 }
 0x441   :  { %1201 = vpush %v835_v28 }
 0x472   :  { %s1202_s2 = spop %1201 }
 0x473   :  { %s837_s22 = smul.f32 0.125, %s1202_s2 }
 0x475   :  { %v838_v29 = vstv %s837_s22 }
 0x476   :  { %840 = vst.msk [vmem:[#allocation2] sm:$0x1] %vm839_vm4, %v838_v29 }
 0x477   :  { %851 = dma.vmem_to_hbm [thread:$0]  %s847_s18, 16, %s849_s21, [#allocation3]  }
 0x478   :  { %1240 = dma.done.wait [#allocation3], 16  }
 0x479   :  { %1241 = vsyncadd [#allocation3], 4294967280 }
 0x47a   :  { %856 = vsyncpa [#allocation3], 1 }

</bundles_post_ra>
